<compile_context>
chip_gen: v6e
topology: v6e:2x2x1
jax: 0.10.0
libtpu: 0.0.40
codegen_flags: <defaults>
</compile_context>

<pallas_src>
import functools
import math

import jax
import jax.numpy as jnp
from jax import lax
from jax.experimental import pallas as pl
from jax.experimental.pallas import tpu as pltpu


# ---------------------------------------------------------------------------
# helpers
# ---------------------------------------------------------------------------
def _vmem_cap():
    """Physical VMEM capacity (bytes); conservative 64 MiB default (v7x)."""
    try:
        cap = getattr(pltpu.get_tpu_info(), "vmem_capacity_bytes", None)
        if cap:
            return int(cap)
    except Exception:
        pass
    return 64 * 1024 * 1024


def _vmem_limit(est_bytes, cap):
    """Scoped-VMEM limit: estimated working set + headroom, clamped to ~85% phys."""
    want = max(int(est_bytes * 1.5), 32 * 1024 * 1024)
    return min(want, int(cap * 0.85))


def _pick_tile(dim, candidates):
    """Largest candidate that exactly divides `dim`, else the full dim."""
    for c in candidates:
        if c <= dim and dim % c == 0:
            return c
    return dim


def _bytes(dt):
    return jnp.dtype(dt).itemsize


# ---------------------------------------------------------------------------
# Parameter prep (one-time): transpose weights, fold softmax scale, cast dtype
# ---------------------------------------------------------------------------
def prepare_params(raw, n_heads, param_dtype=jnp.bfloat16):
    D = raw["w_out"].shape[0]
    d_head = D // n_heads
    scale = 1.0 / math.sqrt(d_head)
    w_in = raw["w_in"].astype(jnp.float32)
    b_in = raw["b_in"].astype(jnp.float32)
    # Fold the 1/sqrt(d_head) softmax scale into the Q rows (rows 0..D-1 of the
    # PyTorch-layout [3D, D] weight) -> free at runtime.
    w_in = w_in.at[:D].multiply(scale)
    b_in = b_in.at[:D].multiply(scale)
    return {
        "w_in_t": jnp.asarray(w_in.T, dtype=param_dtype),        # [D, 3D]
        "b_in": b_in,                                            # f32 (post-accum add)
        "w_out_t": jnp.asarray(raw["w_out"].T, dtype=param_dtype),  # [D, D]
        "b_out": raw["b_out"].astype(jnp.float32),
    }


# ---------------------------------------------------------------------------
# Kernel 1: tiled Linear  (out = x @ Wt + b), Wt already [K, N]
# ---------------------------------------------------------------------------
def _linear_kernel(x_ref, wt_ref, b_ref, o_ref, acc_ref, *, mxu_dtype):
    k = pl.program_id(2)

    @pl.when(k == 0)
    def _init():
        acc_ref[...] = jnp.zeros_like(acc_ref)

    acc_ref[...] += jnp.dot(
        x_ref[...].astype(mxu_dtype),
        wt_ref[...].astype(mxu_dtype),
        preferred_element_type=jnp.float32,
    )

    @pl.when(k == pl.num_programs(2) - 1)
    def _finalize():
        o_ref[...] = (acc_ref[...] + b_ref[...]).astype(o_ref.dtype)


def linear(x2d, wt, b, *, out_dtype=jnp.float32, mxu_dtype=jnp.bfloat16):
    M, K = x2d.shape
    K2, N = wt.shape
    assert K2 == K
    b2d = b.reshape(1, N)

    tm = _pick_tile(M, (512, 256, 128))
    tn = _pick_tile(N, (512, 256, 128))
    tk = _pick_tile(K, (512, 256, 128))

    cap = _vmem_cap()
    xb, wb, ob = _bytes(x2d.dtype), _bytes(wt.dtype), _bytes(out_dtype)
    est = (2 * tm * tk * xb + 2 * tk * tn * wb + 2 * tm * tn * ob
           + tm * tn * 4 + 2 * tn * 4)
    if est > int(cap * 0.85):
        raise ValueError(
            f"linear working set {est} B exceeds VMEM ({cap} B); "
            f"pad M/N/K to a 128-divisible size")

    grid = (M // tm, N // tn, K // tk)
    kern = functools.partial(_linear_kernel, mxu_dtype=mxu_dtype)
    return pl.pallas_call(
        kern,
        out_shape=jax.ShapeDtypeStruct((M, N), out_dtype),
        grid=grid,
        in_specs=[
            pl.BlockSpec((tm, tk), lambda i, j, k: (i, k)),
            pl.BlockSpec((tk, tn), lambda i, j, k: (k, j)),
            pl.BlockSpec((1, tn), lambda i, j, k: (0, j)),
        ],
        out_specs=pl.BlockSpec((tm, tn), lambda i, j, k: (i, j)),
        scratch_shapes=[pltpu.VMEM((tm, tn), jnp.float32)],
        compiler_params=pltpu.CompilerParams(
            dimension_semantics=("parallel", "parallel", "arbitrary"),
            vmem_limit_bytes=_vmem_limit(est, cap)),
        cost_estimate=pl.CostEstimate(
            flops=2 * M * N * K,
            transcendentals=0,
            bytes_accessed=xb * M * K + wb * K * N + ob * M * N + 4 * N),
    )(x2d, wt, b2d)


# ---------------------------------------------------------------------------
# Kernel 2: flash-style multi-head attention, q/k/v/out kept in [B, S, D]
# ---------------------------------------------------------------------------
def _flash_attn_kernel(q_ref, k_ref, v_ref, o_ref,
                       qh_ref, m_ref, l_ref, acc_ref, *,
                       n_heads, d_head, causal, tq, tkv, mxu_dtype):
    qi = pl.program_id(1)
    ki = pl.program_id(2)
    nk = pl.num_programs(2)

    @pl.when(ki == 0)
    def _init():
        m_ref[...] = jnp.full_like(m_ref, -jnp.inf)
        l_ref[...] = jnp.zeros_like(l_ref)
        acc_ref[...] = jnp.zeros_like(acc_ref)
        # Stage the Q tile head-batched ONCE per Q tile (reused for every KV step).
        q_blk = q_ref[0]                                           # [tq, D]
        qh_ref[...] = jnp.stack(
            [q_blk[:, h * d_head:(h + 1) * d_head] for h in range(n_heads)],
            axis=0).astype(mxu_dtype)                              # [H, tq, dh]

    def _tile(apply_mask):
        k_blk = k_ref[0]                                           # [tkv, D]
        v_blk = v_ref[0]                                           # [tkv, D]
        k_hs = jnp.stack(
            [k_blk[:, h * d_head:(h + 1) * d_head] for h in range(n_heads)],
            axis=0).astype(mxu_dtype)                              # [H, tkv, dh]
        v_hs = jnp.stack(
            [v_blk[:, h * d_head:(h + 1) * d_head] for h in range(n_heads)],
            axis=0).astype(mxu_dtype)                              # [H, tkv, dh]

        # Batched QK^T over heads (leading batch dim -> back-to-back MXU pushes).
        s = lax.dot_general(qh_ref[...], k_hs,
                            (((2,), (2,)), ((0,), (0,))),
                            preferred_element_type=jnp.float32)    # [H, tq, tkv]
        if apply_mask:
            rows = qi * tq + lax.broadcasted_iota(jnp.int32, (tq, tkv), 0)
            cols = ki * tkv + lax.broadcasted_iota(jnp.int32, (tq, tkv), 1)
            # -inf is safe: ki==0 always contains an unmasked column for every
            # row, so m_ref is finite before it is ever used in exp / division.
            s = jnp.where((cols > rows)[None, :, :], -jnp.inf, s)

        m_prev = m_ref[...]                                        # [H, tq, 1]
        m_new = jnp.maximum(m_prev, jnp.max(s, axis=-1, keepdims=True))
        alpha = jnp.exp(m_prev - m_new)
        p = jnp.exp(s - m_new)                                     # [H, tq, tkv]
        l_ref[...] = alpha * l_ref[...] + jnp.sum(p, axis=-1, keepdims=True)
        m_ref[...] = m_new
        pv = lax.dot_general(p.astype(mxu_dtype), v_hs,
                             (((2,), (1,)), ((0,), (0,))),
                             preferred_element_type=jnp.float32)   # [H, tq, dh]
        acc_ref[...] = alpha * acc_ref[...] + pv

    if causal:
        in_range = ki * tkv <= qi * tq + (tq - 1)    # tile has an unmasked column
        unmasked = ki * tkv + (tkv - 1) <= qi * tq   # tile entirely on/below diag

        @pl.when(in_range & unmasked)
        def _():
            _tile(apply_mask=False)

        @pl.when(in_range & jnp.logical_not(unmasked))
        def _():
            _tile(apply_mask=True)
    else:
        _tile(apply_mask=False)

    @pl.when(ki == nk - 1)
    def _finalize():
        # approx reciprocal (EUP slot): ~1e-3-level error in normalization.
        inv_l = pl.reciprocal(l_ref[...], approx=True)             # [H, tq, 1]
        out = acc_ref[...] * inv_l                                 # [H, tq, dh]
        # H narrow VMEM writes once per Q tile; the HBM writeback block itself
        # stays lane-dense (width D).
        for h in range(n_heads):
            o_ref[0, :, h * d_head:(h + 1) * d_head] = out[h].astype(o_ref.dtype)


def _attn_tiles(S, D, n_heads, d_head, in_b, out_b, cap):
    def est(tq, tkv):
        io = (2 * tq * D * in_b            # q (double-buffered)
              + 2 * 2 * tkv * D * in_b     # k, v (double-buffered)
              + 2 * tq * D * out_b)        # out (double-buffered)
        scr = (n_heads * tq * d_head * in_b        # staged Q heads
               + n_heads * tq * d_head * 4         # acc
               + 2 * n_heads * tq * 4)             # m, l
        return io + scr

    tq_c = [c for c in (256, 128) if c <= S and S % c == 0] or [S]
    tkv_c = [c for c in (512, 256, 128) if c <= S and S % c == 0] or [S]
    budget = int(cap * 0.4)
    for tq in tq_c:
        for tkv in tkv_c:
            if est(tq, tkv) <= budget:
                return tq, tkv, est(tq, tkv)
    tq, tkv = tq_c[-1], tkv_c[-1]
    e = est(tq, tkv)
    if e > int(cap * 0.85):
        raise ValueError(
            f"attention working set {e} B exceeds VMEM ({cap} B); "
            f"pad S to a multiple of 128 or reduce d_embed")
    return tq, tkv, e


def flash_attention(qkv, *, n_heads, causal=False,
                    mxu_dtype=jnp.bfloat16, out_dtype=None):
    """qkv: [B, S, 3*D] packed in_proj output (q | k | v along the last axis)."""
    B, S, D3 = qkv.shape
    D = D3 // 3
    d_head = D // n_heads
    out_dtype = mxu_dtype if out_dtype is None else out_dtype

    cap = _vmem_cap()
    in_b, out_b = _bytes(qkv.dtype), _bytes(out_dtype)
    tq, tkv, est = _attn_tiles(S, D, n_heads, d_head, in_b, out_b, cap)
    grid = (B, S // tq, S // tkv)

    packed = (D % 128 == 0)
    if packed:
        ops = (qkv, qkv, qkv)
        feat = (0, 1, 2)          # q / k / v feature-block offsets inside [.., 3D]
    else:
        # D-wide blocks of a 3D-wide array violate the (8,128) rule for small D.
        # TODO(synk): pad d_embed to a multiple of 128 to drop these split copies.
        ops = tuple(jnp.split(qkv, 3, axis=-1))
        feat = (0, 0, 0)

    def q_map(b, qi, ki, f=feat[0]):
        return (b, qi, f)

    def kv_map(f):
        if causal:
            # Clamp masked KV steps onto the last needed block: Pallas skips the
            # DMA when the block index is unchanged, so fully-masked tiles are
            # never fetched from HBM (compute is skipped via pl.when).
            def m(b, qi, ki):
                return (b, jnp.minimum(ki, (qi * tq + (tq - 1)) // tkv), f)
        else:
            def m(b, qi, ki):
                return (b, ki, f)
        return m

    kern = functools.partial(
        _flash_attn_kernel, n_heads=n_heads, d_head=d_head, causal=causal,
        tq=tq, tkv=tkv, mxu_dtype=mxu_dtype)

    return pl.pallas_call(
        kern,
        out_shape=jax.ShapeDtypeStruct((B, S, D), out_dtype),
        grid=grid,
        in_specs=[pl.BlockSpec((1, tq, D), q_map),
                  pl.BlockSpec((1, tkv, D), kv_map(feat[1])),
                  pl.BlockSpec((1, tkv, D), kv_map(feat[2]))],
        out_specs=pl.BlockSpec((1, tq, D), lambda b, qi, ki: (b, qi, 0)),
        scratch_shapes=[
            pltpu.VMEM((n_heads, tq, d_head), mxu_dtype),     # staged Q heads
            pltpu.VMEM((n_heads, tq, 1), jnp.float32),        # running max m
            pltpu.VMEM((n_heads, tq, 1), jnp.float32),        # running sum l
            pltpu.VMEM((n_heads, tq, d_head), jnp.float32),   # running acc
        ],
        compiler_params=pltpu.CompilerParams(
            dimension_semantics=("parallel", "parallel", "arbitrary"),
            vmem_limit_bytes=_vmem_limit(est, cap)),
        cost_estimate=pl.CostEstimate(
            flops=4 * B * S * S * D,
            transcendentals=B * n_heads * S * S,
            bytes_accessed=in_b * 3 * B * S * D + out_b * B * S * D),
    )(*ops)


# ---------------------------------------------------------------------------
# SelfAttention forward pass
# ---------------------------------------------------------------------------
def self_attention_forward(x, params, n_heads, causal_mask=False,
                           mxu_dtype=jnp.bfloat16):
    B, S, D = x.shape
    inter = mxu_dtype        # dtype of q/k/v and the attention output (f32 accum inside)

    # in_proj on flattened tokens (scale already folded into the Q rows)
    qkv = linear(x.reshape(B * S, D), params["w_in_t"], params["b_in"],
                 out_dtype=inter, mxu_dtype=mxu_dtype).reshape(B, S, 3 * D)

    # attention core: heads handled inside the kernel, output stays [B, S, D]
    attn = flash_attention(qkv, n_heads=n_heads, causal=causal_mask,
                           mxu_dtype=mxu_dtype, out_dtype=inter)

    # out_proj
    out = linear(attn.reshape(B * S, D), params["w_out_t"], params["b_out"],
                 out_dtype=jnp.float32, mxu_dtype=mxu_dtype)
    return out.reshape(B, S, D)


# ---------------------------------------------------------------------------
# Pure-JAX reference (for correctness check) — takes the RAW PyTorch params
# ---------------------------------------------------------------------------
def reference_forward(x, params, n_heads, causal_mask=False):
    B, S, D = x.shape
    dh = D // n_heads
    qkv = x @ params["w_in"].T + params["b_in"]
    q, k, v = jnp.split(qkv, 3, axis=-1)

    def to_heads(t):
        return t.reshape(B, S, n_heads, dh).transpose(0, 2, 1, 3)

    q, k, v = to_heads(q), to_heads(k), to_heads(v)
    w = jnp.einsum("bhqd,bhkd->bhqk", q, k)
    if causal_mask:
        mask = jnp.triu(jnp.ones((S, S), dtype=bool), k=1)
        w = jnp.where(mask, -jnp.inf, w)
    w = w / math.sqrt(dh)
    w = jax.nn.softmax(w, axis=-1)
    out = jnp.einsum("bhqk,bhkd->bhqd", w, v)
    out = out.transpose(0, 2, 1, 3).reshape(B, S, D)
    return out @ params["w_out"].T + params["b_out"]


# ---------------------------------------------------------------------------
if __name__ == "__main__":
    # Small shapes consistent with the module: batch=2, seq=8, d_embed=32, heads=4
    B, S, D, H = 2, 8, 32, 4

    key = jax.random.PRNGKey(0)
    k_x, k_wi, k_bi, k_wo, k_bo = jax.random.split(key, 5)

    x = jax.random.normal(k_x, (B, S, D), dtype=jnp.float32)

    # Deterministic parameters, PyTorch nn.Linear weight layout.
    raw = {
        "w_in":  jax.random.normal(k_wi, (3 * D, D), dtype=jnp.float32) * 0.05,
        "b_in":  jax.random.normal(k_bi, (3 * D,), dtype=jnp.float32) * 0.05,
        "w_out": jax.random.normal(k_wo, (D, D), dtype=jnp.float32) * 0.05,
        "b_out": jax.random.normal(k_bo, (D,), dtype=jnp.float32) * 0.05,
    }

    for causal in (False, True):
        ref = reference_forward(x, raw, n_heads=H, causal_mask=causal)

        # default bf16 MXU path (looser tolerance: bf16 inputs, f32 accumulation)
        p_bf16 = prepare_params(raw, n_heads=H, param_dtype=jnp.bfloat16)
        out = jax.block_until_ready(
            self_attention_forward(x, p_bf16, n_heads=H, causal_mask=causal,
                                   mxu_dtype=jnp.bfloat16))
        assert out.shape == (B, S, D)
        assert jnp.allclose(out, ref, atol=2.5e-2, rtol=2.5e-2), \
            f"bf16 mismatch vs reference (causal={causal})"

        # f32 MXU path (tight numeric check of the kernel logic)
        p_f32 = prepare_params(raw, n_heads=H, param_dtype=jnp.float32)
        out32 = jax.block_until_ready(
            self_attention_forward(x, p_f32, n_heads=H, causal_mask=causal,
                                   mxu_dtype=jnp.float32))
        assert jnp.allclose(out32, ref, atol=2e-3, rtol=2e-3), \
            f"f32 mismatch vs reference (causal={causal})"

    print("KERNEL_OK")
</pallas_src>

<mosaic_0001>
module attributes {stable_mosaic.version = 11 : i64} {
  func.func @_linear_kernel(%arg0: i32, %arg1: i32, %arg2: i32, %arg3: memref<16x32xf32, #tpu.memory_space<vmem>>, %arg4: memref<32x96xbf16, #tpu.memory_space<vmem>>, %arg5: memref<1x96xf32, #tpu.memory_space<vmem>>, %arg6: memref<16x96xbf16, #tpu.memory_space<vmem>>, %arg7: memref<16x96xf32, #tpu.memory_space<vmem>>) attributes {dimension_semantics = [#tpu.dimension_semantics<parallel>, #tpu.dimension_semantics<parallel>, #tpu.dimension_semantics<arbitrary>], iteration_bounds = array<i64: 1, 1, 1>, scalar_prefetch = 0 : i64, scratch_operands = 1 : i64, tpu.core_type = #tpu.core_type<tc>, window_params = [{transform_indices = @transform_0, window_bounds = array<i64: 16, 32>}, {transform_indices = @transform_1, window_bounds = array<i64: 32, 96>}, {transform_indices = @transform_2, window_bounds = array<i64: 1, 96>}, {transform_indices = @transform_3, window_bounds = array<i64: 16, 96>}]} {
    %c0_i32 = arith.constant 0 : i32
    %0 = arith.cmpi eq, %arg2, %c0_i32 : i32
    %1 = arith.extui %0 : i1 to i32
    %c0_i32_0 = arith.constant 0 : i32
    %2 = arith.cmpi ne, %1, %c0_i32_0 : i32
    scf.if %2 {
      %cst_10 = arith.constant 0.000000e+00 : f32
      %13 = vector.broadcast %cst_10 : f32 to vector<16x96xf32>
      %c0_11 = arith.constant 0 : index
      %c0_12 = arith.constant 0 : index
      %14 = vector.load %arg7[%c0_11, %c0_12] : memref<16x96xf32, #tpu.memory_space<vmem>>, vector<16x96xf32>
      tpu.vector_store %arg7[%c0_11, %c0_12], %13 {strides = array<i32>} : memref<16x96xf32, #tpu.memory_space<vmem>>, vector<16x96xf32>,
    } else {
    }
    %c0 = arith.constant 0 : index
    %c0_1 = arith.constant 0 : index
    %3 = vector.load %arg7[%c0, %c0_1] : memref<16x96xf32, #tpu.memory_space<vmem>>, vector<16x96xf32>
    %c0_2 = arith.constant 0 : index
    %c0_3 = arith.constant 0 : index
    %4 = vector.load %arg3[%c0_2, %c0_3] : memref<16x32xf32, #tpu.memory_space<vmem>>, vector<16x32xf32>
    %5 = arith.truncf %4 : vector<16x32xf32> to vector<16x32xbf16>
    %c0_4 = arith.constant 0 : index
    %c0_5 = arith.constant 0 : index
    %6 = vector.load %arg4[%c0_4, %c0_5] : memref<32x96xbf16, #tpu.memory_space<vmem>>, vector<32x96xbf16>
    %cst = arith.constant dense<0.000000e+00> : vector<16x96xf32>
    %7 = tpu.matmul %5, %6, %cst {dimension_numbers = #tpu.dot_dimension_numbers<[1], [0], [0], [1], [0, 0, 1, 1], [], []>} : vector<16x32xbf16>, vector<32x96xbf16>, vector<16x96xf32> -> vector<16x96xf32>
    %8 = arith.addf %3, %7 : vector<16x96xf32>
    %c0_6 = arith.constant 0 : index
    %c0_7 = arith.constant 0 : index
    %9 = vector.load %arg7[%c0_6, %c0_7] : memref<16x96xf32, #tpu.memory_space<vmem>>, vector<16x96xf32>
    tpu.vector_store %arg7[%c0_6, %c0_7], %8 {strides = array<i32>} : memref<16x96xf32, #tpu.memory_space<vmem>>, vector<16x96xf32>,
    %c0_i32_8 = arith.constant 0 : i32
    %10 = arith.cmpi eq, %arg2, %c0_i32_8 : i32
    %11 = arith.extui %10 : i1 to i32
    %c0_i32_9 = arith.constant 0 : i32
    %12 = arith.cmpi ne, %11, %c0_i32_9 : i32
    scf.if %12 {
      %c0_10 = arith.constant 0 : index
      %c0_11 = arith.constant 0 : index
      %13 = vector.load %arg7[%c0_10, %c0_11] : memref<16x96xf32, #tpu.memory_space<vmem>>, vector<16x96xf32>
      %c0_12 = arith.constant 0 : index
      %c0_13 = arith.constant 0 : index
      %14 = vector.load %arg5[%c0_12, %c0_13] : memref<1x96xf32, #tpu.memory_space<vmem>>, vector<1x96xf32>
      %15 = vector.broadcast %14 : vector<1x96xf32> to vector<16x96xf32>
      %16 = arith.addf %13, %15 : vector<16x96xf32>
      %17 = arith.truncf %16 : vector<16x96xf32> to vector<16x96xbf16>
      %c0_14 = arith.constant 0 : index
      %c0_15 = arith.constant 0 : index
      %18 = vector.load %arg6[%c0_14, %c0_15] : memref<16x96xbf16, #tpu.memory_space<vmem>>, vector<16x96xbf16>
      tpu.vector_store %arg6[%c0_14, %c0_15], %17 {strides = array<i32>} : memref<16x96xbf16, #tpu.memory_space<vmem>>, vector<16x96xbf16>,
    } else {
    }
    return
  }
  func.func @transform_0(%arg0: i32, %arg1: i32, %arg2: i32) -> (i32, i32) {
    %c0_i32 = arith.constant 0 : i32
    return %arg0, %arg2 : i32, i32
  }
  func.func @transform_1(%arg0: i32, %arg1: i32, %arg2: i32) -> (i32, i32) {
    %c0_i32 = arith.constant 0 : i32
    return %arg2, %arg1 : i32, i32
  }
  func.func @transform_2(%arg0: i32, %arg1: i32, %arg2: i32) -> (i32, i32) {
    %c0_i32 = arith.constant 0 : i32
    %c0_i32_0 = arith.constant 0 : i32
    return %c0_i32, %arg1 : i32, i32
  }
  func.func @transform_3(%arg0: i32, %arg1: i32, %arg2: i32) -> (i32, i32) {
    %c0_i32 = arith.constant 0 : i32
    return %arg0, %arg1 : i32, i32
  }
}

</mosaic_0001>

<bundles_post_ra>
// kernel: tpu_custom_call.1
= control target key start
LH: loop header
LB: loop body
LE: loop exit
PB: predicated region body
PF: predicated region fallthrough
CT: control target
= control target key end

     0   :  { %8 = vsyncpa [#allocation4], 0  ;;  %s312_s0 = inlined_call_operand.hbm [shape: f32[16,32], index: 0, kind: input, shape index: {}]   ;;  %s313_s1 = inlined_call_operand.hbm [shape: bf16[32,96], index: 1, kind: input, shape index: {}]   ;;  %s314_s2 = inlined_call_operand.vmem [shape: f32[1,96], index: 2, kind: input, shape index: {}]   ;;  %s315_s3 = inlined_call_operand.hbm [shape: bf16[16,96], index: 3, kind: output, shape index: {}]  }
   0x1   :  { %9 = vsyncpa [#allocation7], 0 }
   0x2   :  { %10 = vsyncpa [#allocation5], 0  ;;  %s261_s12 = smov [#allocation3]  }
   0x3   :  { %s16_s13 = sshll.u32 %s261_s12, 4  ;;  %s17_s13 = int_to_ptr.vmem [resolvable:$true] %s16_s13 }
   0x4   :  { %s203_s14 = scalar_lea.vmem %s17_s13, 256  ;;  %p208_p1 = scmp.lt.s32.totalorder %s17_s13, %s17_s13 }
   0x5   :  { %p204_p0 = scmp.ne.s32.totalorder %s17_s13, %s203_s14  ;;  %p209_p2 = scmp.lt.s32.totalorder %s203_s14, %s203_s14 }
   0x7   :  { %p210_p3 = por %p209_p2, %p208_p1 }
   0x9   :  { %p211_p4 = pnand %p210_p3, %p204_p0 }
   0xb   :  { %214 = shalt.err (!%p211_p4)
}
   0xc   :  { %s262_s15 = smov 128   ;;  %s263_s16 = smov 8  }
   0xd   :  { %22 = dma.hbm_to_vmem [thread:$0]  %s312_s0, 256, %s17_s13, [#allocation4], %s262_s15, %s262_s15, %s263_s16  }
   0xe   :  { %s264_s19 = smov [#allocation6]  }
   0xf   :  { %s28_s20 = sshll.u32 %s264_s19, 4  ;;  %s29_s20 = int_to_ptr.vmem [resolvable:$true] %s28_s20 }
  0x10   :  { %s223_s21 = scalar_lea.vmem %s29_s20, 256  ;;  %p228_p6 = scmp.lt.s32.totalorder %s29_s20, %s29_s20 }
  0x11   :  { %p224_p5 = scmp.ne.s32.totalorder %s29_s20, %s223_s21  ;;  %p229_p7 = scmp.lt.s32.totalorder %s223_s21, %s223_s21 }
  0x13   :  { %p230_p8 = por %p229_p7, %p228_p6 }
  0x15   :  { %p231_p9 = pnand %p230_p8, %p224_p5 }
  0x17   :  { %234 = shalt.err (!%p231_p9)
}
  0x18   :  { %s265_s22 = smov 64   ;;  %s266_s23 = smov 4  }
  0x19   :  { %34 = dma.hbm_to_vmem [thread:$0]  %s313_s1, 256, %s29_s20, [#allocation7], %s265_s22, %s265_s22, %s266_s23  }
  0x1a   :  { %255 = dma.done.wait [#allocation4], 256  }
  0x1b   :  { %256 = vsyncadd [#allocation4], 4294967040 }
  0x1c   :  { %257 = dma.done.wait [#allocation7], 256  }
  0x1d   :  { %258 = vsyncadd [#allocation7], 4294967040  ;;  %vm48_vm0 = vcmask 785408   ;;  %v267_v0 = vmov 0.0   ;;  %vm268_vm1 = vmmov 0   ;;  %v193_v1 = vld [vmem:[#allocation6 + $0x8] sm:$0xff]  }
  0x1e   :  { %49 = vst.msk [vmem:[#allocation2] sm:$0xff] %vm48_vm0, %v267_v0  ;;  %50 = vst.msk [vmem:[#allocation2 + $0x8] sm:$0xff] %vm48_vm0, %v267_v0  ;;  %176 = vmatprep.subr.bf16.mxu0 %v267_v0  ;;  %180 = vmatprep.mubr.msk.bf16.mxu0 %vm268_vm1, %v267_v0  ;;  %v194_v2 = vld [vmem:[#allocation6] sm:$0xff]   ;;  %v53_v3 = vld [vmem:[#allocation3] sm:$0xff]  ;;  %vm72_vm2 = vcmask 261120   ;;  %vm144_vm3 = vcmask 781312  }
  0x1f   :  { %177 = vmatpush3.bf16.msra.mxu0 %v193_v1  ;;  %v54_v4 = vld [vmem:[#allocation3 + $0x8] sm:$0xff]  ;;  %v168_v14 = vld [vmem:[%s314_s2] ss:$0 sm:$0xff]  ;;  %s269_s26 = smov [#allocation8]  }
  0x20   :  { %178 = vmatprep.subr.bf16.mxu0 %v267_v0  ;;  %v55_v5 = vpack.c.bf16 %v54_v4, %v53_v3  ;;  %s152_s27 = sshll.u32 %s269_s26, 4  ;;  %s153_s27 = int_to_ptr.vmem [resolvable:$true] %s152_s27 }
  0x21   :  { %s235_s28 = scalar_lea.vmem %s153_s27, 128  ;;  %p240_p11 = scmp.lt.s32.totalorder %s153_s27, %s153_s27 }
  0x22   :  { %p236_p10 = scmp.ne.s32.totalorder %s153_s27, %s235_s28  ;;  %p241_p12 = scmp.lt.s32.totalorder %s235_s28, %s235_s28 }
  0x23   :  { %179 = vmatpush3.bf16.msra.mxu0 %v194_v2 }
  0x24   :  { %p242_p13 = por %p241_p12, %p240_p11 }
  0x25   :  { %v51_v6 = vld [vmem:[#allocation2] sm:$0xff]  ;;  %v52_v10 = vld [vmem:[#allocation2 + $0x8] sm:$0xff] }
  0x26   :  { %181 = vmatmul.mubr.msk.bf16.vlgmr.msra.gmra.mxu0 %vm72_vm2, %v55_v5  ;;  %p243_p0 = pnand %p242_p13, %p236_p10 }
  0xe6   :  { %v110_v7 = vpop.f32.mrf.mxu0 }
  0xe7   :  { %v117_v8 = vadd.f32 %v110_v7, %v51_v6 }
  0xe8   :  { %v182_v9 = vpop.f32.mrf.mxu0 }
  0xe9   :  { %120 = vst.msk [vmem:[#allocation2] sm:$0xff] %vm48_vm0, %v117_v8 }
  0xea   :  { %v113_v11 = vpop.f32.mrf.mxu0 }
  0xeb   :  { %v118_v12 = vadd.f32 %v113_v11, %v52_v10 }
  0xec   :  { %v183_v13 = vpop.f32.mrf.mxu0 }
  0xed   :  { %121 = vst.msk [vmem:[#allocation2 + $0x8] sm:$0xff] %vm48_vm0, %v118_v12 }
  0xf0   :  { %v125_v15 = vld [vmem:[#allocation2] sm:$0xff] }
  0xf1   :  { %v134_v16 = vadd.f32 %v168_v14, %v125_v15 }
  0xf3   :  { %v171_v17 = vpack.c.bf16 %v134_v16, %v134_v16 }
  0xf4   :  { %v126_v18 = vld [vmem:[#allocation2 + $0x8] sm:$0xff] }
  0xf5   :  { %v135_v19 = vadd.f32 %v168_v14, %v126_v18  ;;  %145 = vst.msk [vmem:[#allocation8] sm:$0xf] %vm144_vm3, %v171_v17 }
  0xf7   :  { %v172_v20 = vpack.c.bf16 %v135_v19, %v135_v19 }
  0xf9   :  { %146 = vst.msk [vmem:[#allocation8 + $0x4] sm:$0xf] %vm144_vm3, %v172_v20 }
  0xfa   :  { %246 = shalt.err (!%p243_p0)
}
  0xfb   :  { %158 = dma.vmem_to_hbm [thread:$0]  %s153_s27, 128, %s315_s3, [#allocation5], %s265_s22, %s265_s22, %s266_s23  }
  0xfc   :  { %259 = dma.done.wait [#allocation5], 128  }
  0xfd   :  { %260 = vsyncadd [#allocation5], 4294967168 }
  0xfe   :  { %162 = vsyncpa [#allocation4], 1 }
  0xff   :  { %163 = vsyncpa [#allocation7], 1 }
 0x100   :  { %164 = vsyncpa [#allocation5], 1 }

</bundles_post_ra>
